<compile_context>
chip_gen: v5e
topology: v5e:2x2
jax: 0.10.0
libtpu: 0.0.40
codegen_flags: <defaults>
</compile_context>

<pallas_src>
import functools

import jax
import jax.numpy as jnp
from jax.experimental import pallas as pl
from jax.experimental.pallas import tpu as pltpu

_LANES = 128            # vreg lane width (last block dim)
_SUBLANES = 8           # f32 sublane tile (second-minor block granularity)
_MAX_BLOCK_ROWS = 4096  # (4096, 128) f32 = 2 MiB per block
_PALLAS_MIN_N = 8192    # below this the fused XLA expression wins (launch cost)


def _lv_kernel(y_ref, out_ref, *, h):
    """Lotka-Volterra field on a (block_rows, 128) block of the flat AoS view.

    Lanes alternate [y0, y1, y0, y1, ...].  Every lane needs its pair partner
    (the other species of the same batch element), which lives in the adjacent
    lane; we fetch it with two lane rotations and a parity select.
    """
    x = y_ref[...]                                            # (block_rows, 128)

    lane = jax.lax.broadcasted_iota(jnp.int32, (1, _LANES), 1)
    parity = lane & 1                                         # 0 -> y0 lane, 1 -> y1 lane

    # Tiny runtime probe so correctness does not depend on pltpu.roll's sign
    # convention: rolls_like_np is all-True iff roll(v, s)[i] == v[(i - s) % 128].
    probe = pltpu.roll(lane.astype(jnp.float32), 1, axis=1)
    np_like = probe == ((lane + _LANES - 1) & (_LANES - 1)).astype(jnp.float32)
    flip = jnp.where(np_like, 0, 1)                           # 0 if np.roll convention

    r_a = pltpu.roll(x, _LANES - 1, axis=1)                   # x[i+1] under np.roll convention
    r_b = pltpu.roll(x, 1, axis=1)                            # x[i-1] under np.roll convention
    pick_a = (parity ^ flip) == 0
    partner = jnp.where(pick_a, r_a, r_b)                     # pair partner for every lane

    prod = x * partner                                        # y0*y1 in every lane
    sign = jnp.where(parity == 0, 1.0, -1.0).astype(x.dtype)  # +1 for y0, -1 for y1
    dy = sign * (x - prod)                                    # dy0 = y0 - y0*y1 ; dy1 = -y1 + y0*y1

    if h is None:
        out_ref[...] = dy
    else:
        out_ref[...] = x + h * dy                             # fused explicit-Euler update


def _round_up(x, m):
    return ((x + m - 1) // m) * m


def _choose_block_rows(rows, max_block_rows):
    if rows <= _SUBLANES:
        return rows                      # single tiny block (full second-minor dim is legal)
    # >= 2 grid steps so both v7x TensorCores get work and consecutive-block
    # DMAs overlap; the cap keeps the double-buffered VMEM footprint modest.
    half = pl.cdiv(rows, 2)
    return max(_SUBLANES, min(max_block_rows, _round_up(half, _SUBLANES)))


def _run_flat(y, *, h, max_block_rows):
    n = y.shape[0]
    total = 2 * n
    flat = y.reshape(total)              # free view of the contiguous AoS buffer

    rows = pl.cdiv(total, _LANES)
    padded = rows * _LANES
    if padded != total:                  # only when 2N is not a multiple of 128
        flat = jnp.pad(flat, (0, padded - total))
    x2d = flat.reshape(rows, _LANES)

    block_rows = _choose_block_rows(rows, max_block_rows)
    grid = (pl.cdiv(rows, block_rows),)  # ragged last block: OOB reads masked on store

    out2d = pl.pallas_call(
        functools.partial(_lv_kernel, h=h),
        out_shape=jax.ShapeDtypeStruct((rows, _LANES), y.dtype),
        grid=grid,
        in_specs=[pl.BlockSpec((block_rows, _LANES), lambda i: (i, 0))],
        out_specs=pl.BlockSpec((block_rows, _LANES), lambda i: (i, 0)),
        compiler_params=pltpu.CompilerParams(
            dimension_semantics=("parallel",),     # lets v7x shard the grid over 2 TCs
            vmem_limit_bytes=(40 * 1024 * 1024 if block_rows >= 2048 else None),
        ),
    )(x2d)

    out_flat = out2d.reshape(padded)
    if padded != total:
        out_flat = out_flat[:total]
    return out_flat.reshape(n, 2)


def _ode_ref(y):
    """Plain-JAX reference / small-batch fallback (XLA fuses this into one kernel)."""
    prod = y[:, 0] * y[:, 1]
    return jnp.stack([y[:, 0] - prod, prod - y[:, 1]], axis=1)


def ode_func(y, variable=None, *, use_pallas=None, max_block_rows=_MAX_BLOCK_ROWS):
    """Forward pass of ODEFunc.  `variable` mirrors the unused nn.Parameter."""
    n, c = y.shape
    if c != 2:
        raise ValueError("ODEFunc expects y of shape (N, 2)")
    if use_pallas is None:
        use_pallas = n >= _PALLAS_MIN_N
    if (not use_pallas) or y.dtype != jnp.float32:
        return _ode_ref(y)
    return _run_flat(y, h=None, max_block_rows=max_block_rows)


def ode_func_euler_step(y, h, variable=None, *, use_pallas=None,
                        max_block_rows=_MAX_BLOCK_ROWS):
    """Fused y_next = y + h * f(y): y is read from HBM once, dy never stored."""
    n, c = y.shape
    if c != 2:
        raise ValueError("ODEFunc expects y of shape (N, 2)")
    if use_pallas is None:
        use_pallas = n >= _PALLAS_MIN_N
    if (not use_pallas) or y.dtype != jnp.float32:
        return y + h * _ode_ref(y)
    return _run_flat(y, h=float(h), max_block_rows=max_block_rows)


if __name__ == "__main__":
    key = jax.random.PRNGKey(0)
    k_param, k1, k2, k3 = jax.random.split(key, 4)

    # Deterministic "parameter" (unused in forward, like the PyTorch module).
    variable = jax.random.normal(k_param, ())

    # (a) N=300 : 2N not a multiple of 128 -> tail-pad path, single tiny block.
    # (b) N=4096: rows=64, block=32, grid=(2,) exact -> multi-block pipelining.
    # (c) N=2500: rows=40, block=24, grid=(2,) ragged last block -> edge masking.
    for k, n in ((k1, 300), (k2, 4096), (k3, 2500)):
        y = jax.random.uniform(k, (n, 2), dtype=jnp.float32, minval=0.1, maxval=2.0)
        dy = jax.block_until_ready(ode_func(y, variable, use_pallas=True))
        dy_ref = _ode_ref(y)
        assert dy.shape == y.shape and dy.dtype == y.dtype
        assert jnp.allclose(dy, dy_ref, atol=1e-6, rtol=1e-6), f"mismatch at N={n}"

    # Fused Euler step agrees with y + h * f(y).
    y = jax.random.uniform(k2, (4096, 2), dtype=jnp.float32, minval=0.1, maxval=2.0)
    h = 1e-2
    y_next = jax.block_until_ready(ode_func_euler_step(y, h, variable, use_pallas=True))
    assert jnp.allclose(y_next, y + h * _ode_ref(y), atol=1e-6, rtol=1e-6), "euler mismatch"

    # Default path (small-N fallback) must agree as well.
    y_small = jax.random.uniform(k1, (300, 2), dtype=jnp.float32, minval=0.1, maxval=2.0)
    dy_small = jax.block_until_ready(ode_func(y_small, variable))
    assert jnp.allclose(dy_small, _ode_ref(y_small), atol=1e-6), "fallback mismatch"

    print("KERNEL_OK")
</pallas_src>

<mosaic_0001>
module attributes {stable_mosaic.version = 11 : i64} {
  func.func @_lv_kernel(%arg0: i32, %arg1: memref<5x128xf32, #tpu.memory_space<vmem>>, %arg2: memref<5x128xf32, #tpu.memory_space<vmem>>) attributes {dimension_semantics = [#tpu.dimension_semantics<parallel>], iteration_bounds = array<i64: 1>, scalar_prefetch = 0 : i64, scratch_operands = 0 : i64, tpu.core_type = #tpu.core_type<tc>, window_params = [{transform_indices = @transform_0, window_bounds = array<i64: 5, 128>}, {transform_indices = @transform_1, window_bounds = array<i64: 5, 128>}]} {
    %c0 = arith.constant 0 : index
    %c0_0 = arith.constant 0 : index
    %0 = vector.load %arg1[%c0, %c0_0] : memref<5x128xf32, #tpu.memory_space<vmem>>, vector<5x128xf32>
    %1 = tpu.iota {dimensions = array<i32: 1>} : vector<1x128xi32>
    %c1_i32 = arith.constant 1 : i32
    %2 = vector.broadcast %c1_i32 : i32 to vector<1x128xi32>
    %3 = arith.andi %1, %2 : vector<1x128xi32>
    %4 = arith.sitofp %1 : vector<1x128xi32> to vector<1x128xf32>
    %c1_i32_1 = arith.constant 1 : i32
    %5 = tpu.dynamic_rotate %4 by %c1_i32_1 dim 1 : vector<1x128xf32>, i32 -> vector<1x128xf32>
    %c128_i32 = arith.constant 128 : i32
    %6 = vector.broadcast %c128_i32 : i32 to vector<1x128xi32>
    %7 = arith.addi %1, %6 : vector<1x128xi32>
    %c1_i32_2 = arith.constant 1 : i32
    %8 = vector.broadcast %c1_i32_2 : i32 to vector<1x128xi32>
    %9 = arith.subi %7, %8 : vector<1x128xi32>
    %c127_i32 = arith.constant 127 : i32
    %10 = vector.broadcast %c127_i32 : i32 to vector<1x128xi32>
    %11 = arith.andi %9, %10 : vector<1x128xi32>
    %12 = arith.sitofp %11 : vector<1x128xi32> to vector<1x128xf32>
    %13 = arith.cmpf oeq, %5, %12 : vector<1x128xf32>
    %c0_i32 = arith.constant 0 : i32
    %c1_i32_3 = arith.constant 1 : i32
    %14 = vector.broadcast %c0_i32 : i32 to vector<1x128xi32>
    %15 = vector.broadcast %c1_i32_3 : i32 to vector<1x128xi32>
    %16 = arith.select %13, %14, %15 : vector<1x128xi1>, vector<1x128xi32>
    %c127_i32_4 = arith.constant 127 : i32
    %17 = tpu.dynamic_rotate %0 by %c127_i32_4 dim 1 : vector<5x128xf32>, i32 -> vector<5x128xf32>
    %c1_i32_5 = arith.constant 1 : i32
    %18 = tpu.dynamic_rotate %0 by %c1_i32_5 dim 1 : vector<5x128xf32>, i32 -> vector<5x128xf32>
    %19 = arith.xori %3, %16 : vector<1x128xi32>
    %c0_i32_6 = arith.constant 0 : i32
    %20 = vector.broadcast %c0_i32_6 : i32 to vector<1x128xi32>
    %21 = arith.cmpi eq, %19, %20 : vector<1x128xi32>
    %22 = vector.shape_cast %21 : vector<1x128xi1> to vector<1x128xi1>
    %23 = vector.broadcast %22 : vector<1x128xi1> to vector<5x128xi1>
    %24 = arith.select %23, %17, %18 : vector<5x128xi1>, vector<5x128xf32>
    %25 = arith.mulf %0, %24 : vector<5x128xf32>
    %c0_i32_7 = arith.constant 0 : i32
    %26 = vector.broadcast %c0_i32_7 : i32 to vector<1x128xi32>
    %27 = arith.cmpi eq, %3, %26 : vector<1x128xi32>
    %cst = arith.constant 1.000000e+00 : f32
    %cst_8 = arith.constant -1.000000e+00 : f32
    %28 = vector.broadcast %cst : f32 to vector<1x128xf32>
    %29 = vector.broadcast %cst_8 : f32 to vector<1x128xf32>
    %30 = arith.select %27, %28, %29 : vector<1x128xi1>, vector<1x128xf32>
    %31 = arith.subf %0, %25 : vector<5x128xf32>
    %32 = vector.broadcast %30 : vector<1x128xf32> to vector<5x128xf32>
    %33 = arith.mulf %32, %31 : vector<5x128xf32>
    %c0_9 = arith.constant 0 : index
    %c0_10 = arith.constant 0 : index
    %34 = vector.load %arg2[%c0_9, %c0_10] : memref<5x128xf32, #tpu.memory_space<vmem>>, vector<5x128xf32>
    tpu.vector_store %arg2[%c0_9, %c0_10], %33 {strides = array<i32>} : memref<5x128xf32, #tpu.memory_space<vmem>>, vector<5x128xf32>,
    return
  }
  func.func @transform_0(%arg0: i32) -> (i32, i32) {
    %c0_i32 = arith.constant 0 : i32
    %c0_i32_0 = arith.constant 0 : i32
    return %arg0, %c0_i32 : i32, i32
  }
  func.func @transform_1(%arg0: i32) -> (i32, i32) {
    %c0_i32 = arith.constant 0 : i32
    %c0_i32_0 = arith.constant 0 : i32
    return %arg0, %c0_i32 : i32, i32
  }
}

</mosaic_0001>

<bundles_post_ra>
// kernel: tpu_custom_call.1
= control target key start
LH: loop header
LB: loop body
LE: loop exit
PB: predicated region body
PF: predicated region fallthrough
CT: control target
= control target key end

     0   :  { %6 = vsyncpa [#allocation3], 0  ;;  %s152_s0 = inlined_call_operand.hbm [shape: f32[5,128], index: 0, kind: input, shape index: {}]   ;;  %s153_s1 = inlined_call_operand.hbm [shape: f32[5,128], index: 1, kind: output, shape index: {}]  }
   0x1   :  { %7 = vsyncpa [#allocation4], 0  ;;  %s13_s8 = sshll.u32 %s152_s0, 4  ;;  %s129_s9 = smov [#allocation2]   ;;  %v24_v0 = vlaneseq  ;;  %s14_s8 = int_to_ptr.hbm [resolvable:$true] %s13_s8 }
   0x2   :  { %s15_s10 = sshll.u32 %s129_s9, 4  ;;  %s16_s10 = int_to_ptr.vmem [resolvable:$true] %s15_s10 }
   0x3   :  { %18 = dma.hbm_to_vmem [thread:$0]  %s14_s8, 128, %s16_s10, [#allocation3]  }
   0x4   :  { %125 = dma.done.wait [#allocation3], 128  }
   0x5   :  { %126 = vsyncadd [#allocation3], 4294967168  ;;  %v25_v1 = vand.u32 127, %v24_v0  ;;  %s130_s11 = smov 1   ;;  %v23_v3 = vld [vmem:[#allocation2] sm:$0x1f] }
   0x6   :  { %38 = vrot.lane.b32.xlu1 %v23_v3, %s130_s11  ;;  %s131_s12 = smov 127   ;;  %v132_v10 = vmov 1   ;;  %v133_v13 = vmov 0   ;;  %v134_v20 = vmov -1.0   ;;  %s135_s0 = smov [#allocation5]  }
   0x7   :  { %v27_v2 = vcvt.s32.f32 %v25_v1  ;;  %v30_v4 = vadd.s32 128, %v25_v1  ;;  %v26_v8 = vand.u32 1, %v25_v1  ;;  %s57_s13 = sshll.u32 %s135_s0, 4  ;;  %s59_s16 = sshll.u32 %s153_s1, 4  ;;  %s58_s13 = int_to_ptr.vmem [resolvable:$true] %s57_s13  ;;  %s60_s16 = int_to_ptr.hbm [resolvable:$true] %s59_s16 }
   0x9   :  { %28 = vrot.lane.b32.xlu0 %v27_v2, %s130_s11  ;;  %v69_v5 = vadd.s32 4294967295, %v30_v4  ;;  %vm47_vm2 = vcmp.eq.s32.totalorder %v26_v8, 0 }
   0xa   :  { %v48_v21 = vsel %vm47_vm2, 1.0, %v134_v20 }
   0xb   :  { %v32_v6 = vand.u32 127, %v69_v5 }
   0xd   :  { %v33_v7 = vcvt.s32.f32 %v32_v6 }
  0x11   :  { %36 = vrot.lane.b32.xlu0 %v23_v3, %s131_s12 }
  0x78   :  { %v39_v16 = vpop.permute.xlu1 %38 }
  0x7b   :  { %v29_v9 = vpop.permute.xlu0 %28 }
  0x7c   :  { %vm34_vm0 = vcmp.eq.f32.partialorder %v29_v9, %v33_v7 }
  0x7d   :  { %v35_v11 = vsel %vm34_vm0, 0, %v132_v10 }
  0x7e   :  { %v40_v12 = vxor.u32 %v35_v11, %v26_v8 }
  0x80   :  { %vm41_vm1 = vcmp.eq.s32.totalorder %v40_v12, 0 }
  0x81   :  { %v42_v14 = vsel %vm41_vm1, 1, %v133_v13 }
  0x82   :  { %v43_v15 = vperm.slane %v42_v14, 0 }
  0x83   :  { %v37_v17 = vpop.permute.xlu0 %36 }
  0x84   :  { %vm44_vm3 = vcmp.eq.s32.totalorder %v43_v15, 1 }
  0x85   :  { %v45_v18 = vsel %vm44_vm3, %v37_v17, %v39_v16 }
  0x86   :  { %v46_v19 = vmul.f32 %v45_v18, %v23_v3 }
  0x88   :  { %v49_v22 = vsub.f32 %v23_v3, %v46_v19 }
  0x8a   :  { %v50_v23 = vmul.f32 %v49_v22, %v48_v21 }
  0x8c   :  { %51 = vst [vmem:[#allocation5] sm:$0x1f] %v50_v23 }
  0x8d   :  { %62 = dma.vmem_to_hbm [thread:$0]  %s58_s13, 128, %s60_s16, [#allocation4]  }
  0x8e   :  { %127 = dma.done.wait [#allocation4], 128  }
  0x8f   :  { %128 = vsyncadd [#allocation4], 4294967168 }
  0x90   :  { %67 = vsyncpa [#allocation3], 1 }
  0x91   :  { %68 = vsyncpa [#allocation4], 1 }

</bundles_post_ra>
